<compile_context>
chip_gen: v6e
topology: v6e:2x2x1
jax: 0.10.0
libtpu: 0.0.40
codegen_flags: <defaults>
</compile_context>

<pallas_src>
import jax
import jax.numpy as jnp
from jax.experimental import pallas as pl
from jax.experimental.pallas import tpu as pltpu


def _cayley_kernel(x_ref, o_ref):
    """Elementwise Cayley map on a lane-dense block.

    x_ref / o_ref: (9, B_tile).  Row r holds entry (r // 3, r % 3) of each of
    the B_tile matrices (row-major flattening), batch on the lane axis.
    """
    x = x_ref[...].astype(jnp.float32)

    # A = I + X, one (1, B_tile) row per matrix entry.
    a00 = x[0:1, :] + 1.0
    a01 = x[1:2, :]
    a02 = x[2:3, :]
    a10 = x[3:4, :]
    a11 = x[4:5, :] + 1.0
    a12 = x[5:6, :]
    a20 = x[6:7, :]
    a21 = x[7:8, :]
    a22 = x[8:9, :] + 1.0

    # Cofactors of A (pure elementwise VPU ops across lanes).
    c00 = a11 * a22 - a12 * a21
    c01 = a12 * a20 - a10 * a22
    c02 = a10 * a21 - a11 * a20
    c10 = a02 * a21 - a01 * a22
    c11 = a00 * a22 - a02 * a20
    c12 = a01 * a20 - a00 * a21
    c20 = a01 * a12 - a02 * a11
    c21 = a02 * a10 - a00 * a12
    c22 = a00 * a11 - a01 * a10

    det = a00 * c00 + a01 * c01 + a02 * c02

    # 1/det: EUP approximate reciprocal + one Newton step -> full f32 accuracy.
    inv = pl.reciprocal(det, approx=True)
    inv = inv * (2.0 - det * inv)

    # Y = (I+X)^{-1}(I-X) = 2*A^{-1} - I = (2*adj(A) - det*I) / det,
    # with adj(A)[i, j] = cof[j][i].  Epilogue folded into the assembly; one
    # lane-dense store of the full (9, B_tile) block.
    y = jnp.concatenate(
        [
            (2.0 * c00 - det) * inv,  # y00
            (2.0 * c10) * inv,        # y01
            (2.0 * c20) * inv,        # y02
            (2.0 * c01) * inv,        # y10
            (2.0 * c11 - det) * inv,  # y11
            (2.0 * c21) * inv,        # y12
            (2.0 * c02) * inv,        # y20
            (2.0 * c12) * inv,        # y21
            (2.0 * c22 - det) * inv,  # y22
        ],
        axis=0,
    )
    o_ref[...] = y.astype(o_ref.dtype)


def cayley_map(x):
    """Y = (I + x)^{-1} (I - x) for a single (3, 3) weight (the module forward).

    A single 3x3 solve is entirely launch/DMA-bound, so this path drops the
    grid and index maps: one full-array VMEM block in, one out.
    """
    n, m = x.shape
    assert n == m == 3, "CayleyMap kernel is specialized to 3x3 (nn.Linear(3, 3))"
    x9 = x.reshape(9, 1)  # entries on sublanes, (degenerate) batch on lanes
    y9 = pl.pallas_call(
        _cayley_kernel,
        out_shape=jax.ShapeDtypeStruct((9, 1), x.dtype),
        in_specs=[pl.BlockSpec(memory_space=pltpu.MemorySpace.VMEM)],
        out_specs=pl.BlockSpec(memory_space=pltpu.MemorySpace.VMEM),
    )(x9)
    return y9.reshape(3, 3)


def cayley_map_batched(x, *, lanes_per_tile=512):
    """Batched Cayley map: x is (B, 3, 3) -> (B, 3, 3).

    Batch is laid out on the lane axis ((9, B) slab), the grid iterates over
    lane tiles, and the batch axis is marked "parallel" so v7x shards it
    across both TensorCores.  Pure streaming VPU job -> HBM-roofline bound.
    """
    B = x.shape[0]
    assert x.shape[1:] == (3, 3)
    bt = min(lanes_per_tile, B)
    assert bt % 128 == 0, "lane tile must be a multiple of 128"
    assert B % bt == 0, "batch must be a multiple of the lane tile"
    x9 = x.reshape(B, 9).T  # (9, B): lane-dense, entries on sublanes
    y9 = pl.pallas_call(
        _cayley_kernel,
        out_shape=jax.ShapeDtypeStruct((9, B), x.dtype),
        grid=(B // bt,),
        in_specs=[pl.BlockSpec((9, bt), lambda i: (0, i))],
        out_specs=pl.BlockSpec((9, bt), lambda i: (0, i)),
        compiler_params=pltpu.CompilerParams(
            dimension_semantics=("parallel",)
        ),
    )(x9)
    return y9.T.reshape(B, 3, 3)


if __name__ == "__main__":
    n = 3  # nn.Linear(3, 3) weight is (3, 3)

    # --- single-matrix path: exactly the module's forward -------------------
    key = jax.random.PRNGKey(0)
    x = jax.random.uniform(key, (n, n), dtype=jnp.float32)  # torch.rand_like
    y = cayley_map(x)
    jax.block_until_ready(y)

    I = jnp.eye(n, dtype=jnp.float32)
    ref = jnp.linalg.solve(I + x, I - x)
    assert jnp.allclose(y, ref, rtol=1e-3, atol=1e-4), (y, ref)

    # --- batched path: many independent 3x3 parametrizations ----------------
    # (Small demo batch; production should use lanes_per_tile in 512-4096.)
    B = 256
    xb = 0.5 * jax.random.uniform(
        jax.random.PRNGKey(1), (B, n, n), dtype=jnp.float32
    )
    yb = cayley_map_batched(xb, lanes_per_tile=128)
    jax.block_until_ready(yb)

    refb = jnp.linalg.solve(jnp.eye(n, dtype=jnp.float32) + xb,
                            jnp.eye(n, dtype=jnp.float32) - xb)
    assert jnp.allclose(yb, refb, rtol=1e-3, atol=1e-4)

    print("KERNEL_OK")
</pallas_src>

<mosaic_0001>
module attributes {stable_mosaic.version = 11 : i64} {
  func.func @_cayley_kernel(%arg0: memref<9x1xf32, #tpu.memory_space<vmem>>, %arg1: memref<9x1xf32, #tpu.memory_space<vmem>>) attributes {dimension_semantics = [], scalar_prefetch = 0 : i64, scratch_operands = 0 : i64, tpu.core_type = #tpu.core_type<tc>} {
    %c0 = arith.constant 0 : index
    %c0_0 = arith.constant 0 : index
    %0 = vector.load %arg0[%c0, %c0_0] : memref<9x1xf32, #tpu.memory_space<vmem>>, vector<9x1xf32>
    %1 = vector.extract_strided_slice %0 {offsets = [0, 0], sizes = [1, 1], strides = [1, 1]} : vector<9x1xf32> to vector<1x1xf32>
    %cst = arith.constant 1.000000e+00 : f32
    %2 = vector.broadcast %cst : f32 to vector<1x1xf32>
    %3 = arith.addf %1, %2 : vector<1x1xf32>
    %4 = vector.extract_strided_slice %0 {offsets = [1, 0], sizes = [1, 1], strides = [1, 1]} : vector<9x1xf32> to vector<1x1xf32>
    %5 = vector.extract_strided_slice %0 {offsets = [2, 0], sizes = [1, 1], strides = [1, 1]} : vector<9x1xf32> to vector<1x1xf32>
    %6 = vector.extract_strided_slice %0 {offsets = [3, 0], sizes = [1, 1], strides = [1, 1]} : vector<9x1xf32> to vector<1x1xf32>
    %7 = vector.extract_strided_slice %0 {offsets = [4, 0], sizes = [1, 1], strides = [1, 1]} : vector<9x1xf32> to vector<1x1xf32>
    %cst_1 = arith.constant 1.000000e+00 : f32
    %8 = vector.broadcast %cst_1 : f32 to vector<1x1xf32>
    %9 = arith.addf %7, %8 : vector<1x1xf32>
    %10 = vector.extract_strided_slice %0 {offsets = [5, 0], sizes = [1, 1], strides = [1, 1]} : vector<9x1xf32> to vector<1x1xf32>
    %11 = vector.extract_strided_slice %0 {offsets = [6, 0], sizes = [1, 1], strides = [1, 1]} : vector<9x1xf32> to vector<1x1xf32>
    %12 = vector.extract_strided_slice %0 {offsets = [7, 0], sizes = [1, 1], strides = [1, 1]} : vector<9x1xf32> to vector<1x1xf32>
    %13 = vector.extract_strided_slice %0 {offsets = [8, 0], sizes = [1, 1], strides = [1, 1]} : vector<9x1xf32> to vector<1x1xf32>
    %cst_2 = arith.constant 1.000000e+00 : f32
    %14 = vector.broadcast %cst_2 : f32 to vector<1x1xf32>
    %15 = arith.addf %13, %14 : vector<1x1xf32>
    %16 = arith.mulf %9, %15 : vector<1x1xf32>
    %17 = arith.mulf %10, %12 : vector<1x1xf32>
    %18 = arith.subf %16, %17 : vector<1x1xf32>
    %19 = arith.mulf %10, %11 : vector<1x1xf32>
    %20 = arith.mulf %6, %15 : vector<1x1xf32>
    %21 = arith.subf %19, %20 : vector<1x1xf32>
    %22 = arith.mulf %6, %12 : vector<1x1xf32>
    %23 = arith.mulf %9, %11 : vector<1x1xf32>
    %24 = arith.subf %22, %23 : vector<1x1xf32>
    %25 = arith.mulf %5, %12 : vector<1x1xf32>
    %26 = arith.mulf %4, %15 : vector<1x1xf32>
    %27 = arith.subf %25, %26 : vector<1x1xf32>
    %28 = arith.mulf %3, %15 : vector<1x1xf32>
    %29 = arith.mulf %5, %11 : vector<1x1xf32>
    %30 = arith.subf %28, %29 : vector<1x1xf32>
    %31 = arith.mulf %4, %11 : vector<1x1xf32>
    %32 = arith.mulf %3, %12 : vector<1x1xf32>
    %33 = arith.subf %31, %32 : vector<1x1xf32>
    %34 = arith.mulf %4, %10 : vector<1x1xf32>
    %35 = arith.mulf %5, %9 : vector<1x1xf32>
    %36 = arith.subf %34, %35 : vector<1x1xf32>
    %37 = arith.mulf %5, %6 : vector<1x1xf32>
    %38 = arith.mulf %3, %10 : vector<1x1xf32>
    %39 = arith.subf %37, %38 : vector<1x1xf32>
    %40 = arith.mulf %3, %9 : vector<1x1xf32>
    %41 = arith.mulf %4, %6 : vector<1x1xf32>
    %42 = arith.subf %40, %41 : vector<1x1xf32>
    %43 = arith.mulf %3, %18 : vector<1x1xf32>
    %44 = arith.mulf %4, %21 : vector<1x1xf32>
    %45 = arith.addf %43, %44 : vector<1x1xf32>
    %46 = arith.mulf %5, %24 : vector<1x1xf32>
    %47 = arith.addf %45, %46 : vector<1x1xf32>
    %48 = tpu.reciprocal %47 {approx = true} : vector<1x1xf32> -> vector<1x1xf32>
    %49 = arith.mulf %47, %48 : vector<1x1xf32>
    %cst_3 = arith.constant 2.000000e+00 : f32
    %50 = vector.broadcast %cst_3 : f32 to vector<1x1xf32>
    %51 = arith.subf %50, %49 : vector<1x1xf32>
    %52 = arith.mulf %48, %51 : vector<1x1xf32>
    %cst_4 = arith.constant 2.000000e+00 : f32
    %53 = vector.broadcast %cst_4 : f32 to vector<1x1xf32>
    %54 = arith.mulf %53, %18 : vector<1x1xf32>
    %55 = arith.subf %54, %47 : vector<1x1xf32>
    %56 = arith.mulf %55, %52 : vector<1x1xf32>
    %cst_5 = arith.constant 2.000000e+00 : f32
    %57 = vector.broadcast %cst_5 : f32 to vector<1x1xf32>
    %58 = arith.mulf %57, %27 : vector<1x1xf32>
    %59 = arith.mulf %58, %52 : vector<1x1xf32>
    %cst_6 = arith.constant 2.000000e+00 : f32
    %60 = vector.broadcast %cst_6 : f32 to vector<1x1xf32>
    %61 = arith.mulf %60, %36 : vector<1x1xf32>
    %62 = arith.mulf %61, %52 : vector<1x1xf32>
    %cst_7 = arith.constant 2.000000e+00 : f32
    %63 = vector.broadcast %cst_7 : f32 to vector<1x1xf32>
    %64 = arith.mulf %63, %21 : vector<1x1xf32>
    %65 = arith.mulf %64, %52 : vector<1x1xf32>
    %cst_8 = arith.constant 2.000000e+00 : f32
    %66 = vector.broadcast %cst_8 : f32 to vector<1x1xf32>
    %67 = arith.mulf %66, %30 : vector<1x1xf32>
    %68 = arith.subf %67, %47 : vector<1x1xf32>
    %69 = arith.mulf %68, %52 : vector<1x1xf32>
    %cst_9 = arith.constant 2.000000e+00 : f32
    %70 = vector.broadcast %cst_9 : f32 to vector<1x1xf32>
    %71 = arith.mulf %70, %39 : vector<1x1xf32>
    %72 = arith.mulf %71, %52 : vector<1x1xf32>
    %cst_10 = arith.constant 2.000000e+00 : f32
    %73 = vector.broadcast %cst_10 : f32 to vector<1x1xf32>
    %74 = arith.mulf %73, %24 : vector<1x1xf32>
    %75 = arith.mulf %74, %52 : vector<1x1xf32>
    %cst_11 = arith.constant 2.000000e+00 : f32
    %76 = vector.broadcast %cst_11 : f32 to vector<1x1xf32>
    %77 = arith.mulf %76, %33 : vector<1x1xf32>
    %78 = arith.mulf %77, %52 : vector<1x1xf32>
    %cst_12 = arith.constant 2.000000e+00 : f32
    %79 = vector.broadcast %cst_12 : f32 to vector<1x1xf32>
    %80 = arith.mulf %79, %42 : vector<1x1xf32>
    %81 = arith.subf %80, %47 : vector<1x1xf32>
    %82 = arith.mulf %81, %52 : vector<1x1xf32>
    %83 = tpu.concatenate %56, %59, %62, %65, %69, %72, %75, %78, %82 in 0 : vector<1x1xf32>, vector<1x1xf32>, vector<1x1xf32>, vector<1x1xf32>, vector<1x1xf32>, vector<1x1xf32>, vector<1x1xf32>, vector<1x1xf32>, vector<1x1xf32> -> vector<9x1xf32>
    %c0_13 = arith.constant 0 : index
    %c0_14 = arith.constant 0 : index
    %84 = vector.load %arg1[%c0_13, %c0_14] : memref<9x1xf32, #tpu.memory_space<vmem>>, vector<9x1xf32>
    tpu.vector_store %arg1[%c0_13, %c0_14], %83 {strides = array<i32>} : memref<9x1xf32, #tpu.memory_space<vmem>>, vector<9x1xf32>,
    return
  }
}

</mosaic_0001>

<bundles_post_ra>
// kernel: tpu_custom_call.1
= control target key start
LH: loop header
LB: loop body
LE: loop exit
PB: predicated region body
PF: predicated region fallthrough
CT: control target
= control target key end

     0   :  { %vm180_vm0 = vcmask 0   ;;  %vm164_vm1 = vcmask 1040384   ;;  %vm166_vm2 = vcmask 1041408   ;;  %vm168_vm3 = vcmask 1042432   ;;  %s212_s0 = inlined_call_operand.vmem [shape: f32[9,1], index: 0, kind: input, shape index: {}]   ;;  %s213_s1 = inlined_call_operand.vmem [shape: f32[9,1], index: 1, kind: output, shape index: {}]  }
   0x1   :  { %v8_v0 = vld [vmem:[%s212_s0] sm:$0xff]  ;;  %v9_v1 = vld [vmem:[%s212_s0 + $0x8] sm:$0x1]  ;;  %vm170_vm4 = vcmask 1043456   ;;  %vm172_vm5 = vcmask 1044480   ;;  %vm174_vm6 = vcmask 1045504  }
   0x2   :  { %v10_v2 = vadd.f32 1.0, %v8_v0  ;;  %v11_v3 = vadd.f32 1.0, %v9_v1  ;;  %v17_v4 = vrot.slane %v8_v0, 2  ;;  %v24_v5 = vrot.slane %v8_v0, 1 }
   0x3   :  { %v34_v6 = vrot.slane %v8_v0, 4  ;;  %v57_v34 = vrot.slane %v8_v0, 7  ;;  %v42_v35 = vrot.slane %v8_v0, 5  ;;  %vm176_vm7 = vcmask 1046528  }
   0x4   :  { %v13_v7 = vrot.slane %v11_v3, 4  ;;  %v19_v8 = vmul.f32 %v17_v4, %v8_v0  ;;  %v27_v9 = vrot.slane %v11_v3, 5  ;;  %v37_v11 = vmul.f32 %v17_v4, %v10_v2 }
   0x5   :  { %v36_v10 = vmul.f32 %v34_v6, %v8_v0  ;;  %v26_v14 = vmul.f32 %v24_v5, %v8_v0  ;;  %v45_v31 = vrot.slane %v11_v3, 7  ;;  %v77_v32 = vrot.slane %v10_v2, 4 }
   0x6   :  { %v15_v12 = vmul.f32 %v13_v7, %v10_v2  ;;  %v21_v13 = vrot.slane %v19_v8, 1  ;;  %v29_v15 = vmul.f32 %v27_v9, %v8_v0  ;;  %v39_v16 = vrot.slane %v37_v11, 1 }
   0x7   :  { %v65_v33 = vrot.slane %v10_v2, 2  ;;  %v47_v36 = vmul.f32 %v45_v31, %v8_v0  ;;  %v52_v37 = vmul.f32 %v11_v3, %v10_v2  ;;  %v54_v38 = vrot.slane %v36_v10, 2 }
   0x8   :  { %v23_v17 = vsub.f32 %v15_v12, %v21_v13  ;;  %v31_v18 = vrot.slane %v29_v15, 6  ;;  %v41_v19 = vsub.f32 %v36_v10, %v39_v16  ;;  %v79_v39 = vmul.f32 %v77_v32, %v10_v2 }
   0x9   :  { %v67_v40 = vmul.f32 %v65_v33, %v8_v0  ;;  %v59_v41 = vmul.f32 %v57_v34, %v10_v2  ;;  %v72_v42 = vmul.f32 %v42_v35, %v10_v2  ;;  %v44_v43 = vmul.f32 %v42_v35, %v8_v0 }
   0xa   :  { %v33_v20 = vsub.f32 %v26_v14, %v31_v18  ;;  %v82_v21 = vrot.slane %v23_v17, 4  ;;  %v94_v22 = vrot.slane %v41_v19, 1  ;;  %v49_v44 = vrot.slane %v47_v36, 7 }
   0xb   :  { %v56_v45 = vsub.f32 %v52_v37, %v54_v38  ;;  %v80_v46 = vsub.f32 %v79_v39, %v21_v13  ;;  %v69_v47 = vrot.slane %v67_v40, 1  ;;  %v61_v48 = vrot.slane %v59_v41, 7 }
   0xc   :  { %v86_v23 = vrot.slane %v33_v20, 4  ;;  %v96_v24 = vmul.f32 %v94_v22, %v8_v0  ;;  %v84_v25 = vmul.f32 %v82_v21, %v10_v2  ;;  %v74_v49 = vrot.slane %v72_v42, 6 }
   0xd   :  { %v51_v51 = vsub.f32 %v44_v43, %v49_v44  ;;  %v126_v52 = vmul.f32 2.0, %v56_v45  ;;  %v137_v53 = vmul.f32 2.0, %v80_v46  ;;  %v71_v54 = vsub.f32 %v36_v10, %v69_v47 }
   0xe   :  { %v88_v26 = vmul.f32 %v86_v23, %v8_v0  ;;  %v98_v28 = vrot.slane %v96_v24, 2  ;;  %v105_v56 = vmul.f32 2.0, %v23_v17  ;;  %v63_v58 = vsub.f32 %v44_v43, %v61_v48 }
   0xf   :  { %v76_v59 = vsub.f32 %v26_v14, %v74_v49  ;;  %v114_v61 = vmul.f32 2.0, %v51_v51  ;;  %v118_v2 = vmul.f32 2.0, %v71_v54  ;;  %v122_v3 = vmul.f32 2.0, %v33_v20 }
  0x10   :  { %v90_v27 = vrot.slane %v88_v26, 1  ;;  %v131_v5 = vmul.f32 2.0, %v41_v19  ;;  %v135_v6 = vmul.f32 2.0, %v63_v58  ;;  %vm178_vm8 = vcmask 7168  }
  0x11   :  { %v129_v4 = vmul.f32 2.0, %v76_v59 }
  0x12   :  { %v92_v29 = vadd.f32 %v90_v27, %v84_v25 }
  0x14   :  { %v100_v30 = vadd.f32 %v98_v28, %v92_v29 }
  0x16   :  { %186 = vrcp.f32 %v100_v30  ;;  %v107_v57 = vrot.slane %v100_v30, 4  ;;  %v127_v62 = vsub.f32 %v126_v52, %v100_v30  ;;  %v138_v63 = vsub.f32 %v137_v53, %v100_v30 }
  0x18   :  { %v109_v1 = vsub.f32 %v105_v56, %v107_v57 }
  0x23   :  { %v187_v50 = vpop.eup %186 }
  0x24   :  { %v102_v55 = vmul.f32 %v187_v50, %v100_v30 }
  0x26   :  { %v103_v60 = vsub.f32 2.0, %v102_v55 }
  0x28   :  { %v104_v0 = vmul.f32 %v187_v50, %v103_v60 }
  0x2a   :  { %v111_v7 = vrot.slane %v104_v0, 4  ;;  %v115_v8 = vrot.slane %v104_v0, 6  ;;  %v119_v9 = vrot.slane %v104_v0, 7  ;;  %v123_v10 = vrot.slane %v104_v0, 3 }
  0x2b   :  { %v128_v11 = vmul.f32 %v127_v62, %v104_v0  ;;  %v132_v12 = vrot.slane %v104_v0, 5  ;;  %v139_v13 = vmul.f32 %v138_v63, %v104_v0 }
  0x2c   :  { %v113_v14 = vmul.f32 %v111_v7, %v109_v1  ;;  %v117_v15 = vmul.f32 %v115_v8, %v114_v61  ;;  %v121_v16 = vmul.f32 %v119_v9, %v118_v2  ;;  %v125_v17 = vmul.f32 %v123_v10, %v122_v3 }
  0x2d   :  { %v130_v18 = vmul.f32 %v129_v4, %v115_v8  ;;  %v134_v21 = vmul.f32 %v132_v12, %v131_v5  ;;  %v136_v22 = vmul.f32 %v135_v6, %v119_v9  ;;  %181 = vst.msk [vmem:[%s213_s1 + $0x8] sm:$0x1] %vm180_vm0, %v139_v13  ;;  %v153_v25 = vrot.slane %v128_v11, 4 }
  0x2e   :  { %v141_v19 = vrot.slane %v113_v14, 4  ;;  %v144_v20 = vrot.slane %v117_v15, 1  ;;  %v147_v23 = vrot.slane %v121_v16, 7  ;;  %v150_v24 = vrot.slane %v125_v17, 2 }
  0x2f   :  { %v156_v26 = vrot.slane %v130_v18, 5  ;;  %v159_v28 = vrot.slane %v134_v21, 5  ;;  %v162_v30 = vrot.slane %v136_v22, 2 }
  0x30   :  { %v165_v27 = vsel %vm164_vm1, %v141_v19, %v144_v20 }
  0x31   :  { %v167_v29 = vsel %vm166_vm2, %v165_v27, %v147_v23 }
  0x32   :  { %v169_v31 = vsel %vm168_vm3, %v167_v29, %v150_v24 }
  0x33   :  { %v171_v32 = vsel %vm170_vm4, %v169_v31, %v153_v25 }
  0x34   :  { %v173_v33 = vsel %vm172_vm5, %v171_v32, %v156_v26 }
  0x35   :  { %v175_v34 = vsel %vm174_vm6, %v173_v33, %v159_v28 }
  0x36   :  { %v177_v35 = vsel %vm176_vm7, %v175_v34, %v162_v30 }
  0x37   :  { %179 = vst.msk [vmem:[%s213_s1] sm:$0xff] %vm178_vm8, %v177_v35 }

</bundles_post_ra>
